<compile_context>
chip_gen: v7x
topology: tpu7x:2x2x1
jax: 0.10.0
libtpu: 0.0.40
codegen_flags: <defaults>
</compile_context>

<pallas_src>
import functools
import math

import jax
import jax.numpy as jnp
from jax import lax
from jax.experimental import pallas as pl
from jax.experimental.pallas import tpu as pltpu

_GELU_C = math.sqrt(2.0 / math.pi)


# --------------------------------------------------------------------------- helpers
def _vmem_limit_bytes():
    # ~3/4 of physical VMEM: ~96 MiB on v5e/v6e (128 MiB), ~48 MiB on v7x (64 MiB).
    try:
        cap = pltpu.get_tpu_info().vmem_capacity_bytes
        if cap:
            return int(min(cap * 3 // 4, 110 * 1024 * 1024))
    except Exception:
        pass
    return 48 * 1024 * 1024


def _cparams(semantics):
    return pltpu.CompilerParams(
        dimension_semantics=semantics,
        vmem_limit_bytes=_vmem_limit_bytes(),
    )


def _row_tile(M, itemsize):
    # Bigger row tiles amortize per-grid-step overhead; 512 for bf16-class dtypes,
    # 256 for f32 (keeps the fused proj+MLP kernel comfortably inside VMEM).
    cap = 512 if itemsize <= 2 else 256
    return M if M <= cap else cap


def _n_tile(n, cap=512):
    # Output-column tile: prefer a 128-multiple divisor of n (no ragged tiles),
    # else the largest 128-multiple <= cap (ragged last tile is masked on store).
    if n <= cap:
        return n
    for t in range(cap - cap % 128, 127, -128):
        if n % t == 0:
            return t
    return cap - cap % 128


def _k_tile(n, cap=512):
    # MLP hidden-dim (contraction) tile: MUST divide n, otherwise a ragged tile would
    # fold garbage columns into the accumulator. Falls back to full (resident) if none.
    if n <= cap:
        return n
    for t in range(cap - cap % 128, 127, -128):
        if n % t == 0:
            return t
    return n


def _heads_per_block(n_head, d):
    # Smallest head group whose width hg*d is lane-dense (multiple of 128); fall back
    # to all heads (width == nx, always a legal full-extent block).
    for hg in range(1, n_head + 1):
        if n_head % hg == 0 and (hg * d) % 128 == 0:
            return hg
    # TODO(synk): when no grouping is lane-dense (e.g. GPT-2 XL n_head=25) this groups
    # all heads; for long T a flash-style KV-tiled attention kernel is preferable.
    return n_head


# ------------------------------------------------ kernel 1: ln_1 + c_attn (q/k/v tiled)
def _ln_qkv_kernel(x_ref, g_ref, b_ref, wq_ref, wk_ref, wv_ref,
                   bq_ref, bk_ref, bv_ref, q_ref, k_ref, v_ref, *, eps):
    xf = x_ref[...].astype(jnp.float32)
    mean = jnp.mean(xf, axis=-1, keepdims=True)
    var = jnp.mean((xf - mean) ** 2, axis=-1, keepdims=True)
    y = (xf - mean) * lax.rsqrt(var + eps)
    y = y * g_ref[...].astype(jnp.float32) + b_ref[...].astype(jnp.float32)
    y = y.astype(wq_ref.dtype)                      # native-dtype MXU operands
    for w_ref, bias_ref, o_ref in ((wq_ref, bq_ref, q_ref),
                                   (wk_ref, bk_ref, k_ref),
                                   (wv_ref, bv_ref, v_ref)):
        o = jnp.dot(y, w_ref[...], preferred_element_type=jnp.float32)
        o = o + bias_ref[...].astype(jnp.float32)
        o_ref[...] = o.astype(o_ref.dtype)


# ---------------------------------------- kernel 2: causal attention over head groups
def _attn_kernel(q_ref, k_ref, v_ref, o_ref, *, n_heads_blk, d, scale):
    # q/k/v blocks are (1, T, hg*d) lane-dense column slices of the [B, T, nx] buffers;
    # the output is written directly in merged-head [B, T, nx] layout (merge_heads fused).
    T = q_ref.shape[1]
    q = q_ref[0]
    if scale:
        q = q * (1.0 / math.sqrt(d))                # fold 1/sqrt(d) into q
    k = k_ref[0]
    v = v_ref[0]
    row = lax.broadcasted_iota(jnp.int32, (T, T), 0)
    col = lax.broadcasted_iota(jnp.int32, (T, T), 1)
    causal = col <= row
    for h in range(n_heads_blk):                    # static unroll over the head group
        lo, hi = h * d, (h + 1) * d
        qh, kh, vh = q[:, lo:hi], k[:, lo:hi], v[:, lo:hi]
        # q @ k^T via dot_general contracting the last dims (no explicit K transpose).
        s = lax.dot_general(qh, kh, (((1,), (1,)), ((), ())),
                            preferred_element_type=jnp.float32)
        s = jnp.where(causal, s, jnp.float32(-10000.0))     # HF GPT-2 masked_bias
        s = s - jnp.max(s, axis=-1, keepdims=True)
        p = jnp.exp(s)
        p = p * pl.reciprocal(jnp.sum(p, axis=-1, keepdims=True), approx=True)
        # TODO(synk): attn_dropout is identity in eval mode; training dropout not applied.
        oh = jnp.dot(p.astype(vh.dtype), vh, preferred_element_type=jnp.float32)
        o_ref[0, :, lo:hi] = oh.astype(o_ref.dtype)


# --------------- kernel 3: c_proj + residual + ln_2 + MLP (K-tiled) + residual (fused)
def _proj_mlp_kernel(a_ref, x_ref, wp_ref, bp_ref, g_ref, b_ref,
                     w1_ref, b1_ref, w2_ref, b2_ref, o_ref,
                     x1_ref, y_ref, acc_ref, *, eps):
    j = pl.program_id(1)

    @pl.when(j == 0)
    def _():
        # attention c_proj + first residual, kept in f32 across the MLP K loop.
        proj = jnp.dot(a_ref[...], wp_ref[...], preferred_element_type=jnp.float32)
        x1 = x_ref[...].astype(jnp.float32) + proj + bp_ref[...].astype(jnp.float32)
        x1_ref[...] = x1
        mean = jnp.mean(x1, axis=-1, keepdims=True)
        var = jnp.mean((x1 - mean) ** 2, axis=-1, keepdims=True)
        y = (x1 - mean) * lax.rsqrt(var + eps)
        y = y * g_ref[...].astype(jnp.float32) + b_ref[...].astype(jnp.float32)
        y_ref[...] = y.astype(y_ref.dtype)
        acc_ref[...] = jnp.zeros_like(acc_ref)

    h = jnp.dot(y_ref[...], w1_ref[...], preferred_element_type=jnp.float32)
    h = h + b1_ref[...].astype(jnp.float32)
    # GPT-2 tanh-approx gelu, computed in f32 (tanh on the EUP).
    h = 0.5 * h * (1.0 + jnp.tanh(_GELU_C * (h + 0.044715 * (h * h * h))))
    h = h.astype(w2_ref.dtype)
    acc_ref[...] += jnp.dot(h, w2_ref[...], preferred_element_type=jnp.float32)

    @pl.when(j == pl.num_programs(1) - 1)
    def _():
        # TODO(synk): resid dropouts are identity in eval mode; not applied.
        out = x1_ref[...] + acc_ref[...] + b2_ref[...].astype(jnp.float32)
        o_ref[...] = out.astype(o_ref.dtype)


# --------------------------------------------------------------------------- wrapper
def block_pallas(x, params, *, n_head, eps=1e-5, scale=True):
    """GPT-2 Block forward. x: [B, T, nx] -> [B, T, nx].

    params: ln1_g, ln1_b, w_attn [nx,3nx], b_attn, w_attn_proj [nx,nx], b_attn_proj,
            ln2_g, ln2_b, w_fc [nx,n_state], b_fc, w_proj [n_state,nx], b_proj
    TODO(synk): layer_past / attention_mask / head_mask / use_cache / z /
    output_attentions / head pruning are not implemented (defaults only).
    """
    B, T, nx = x.shape
    M = B * T
    d = nx // n_head
    n_state = params["w_fc"].shape[1]
    dtype = x.dtype
    wdtype = params["w_fc"].dtype
    isz = max(jnp.dtype(dtype).itemsize, jnp.dtype(wdtype).itemsize)

    tile_m = _row_tile(M, isz)
    grid_m = pl.cdiv(M, tile_m)
    tile_nq = _n_tile(nx)
    grid_nq = pl.cdiv(nx, tile_nq)
    tile_s = _k_tile(n_state)
    grid_s = pl.cdiv(n_state, tile_s)
    hg = _heads_per_block(n_head, d)
    gw = hg * d

    x2d = x.reshape(M, nx)

    # One-time weight plumbing (hoist out of the hot path in a real model): split the
    # c_attn weight/bias into q/k/v column blocks so heads stay contiguous per buffer and
    # the attention kernel can address head groups directly (no XLA split/merge_heads).
    w_q, w_k, w_v = (params["w_attn"][:, i * nx:(i + 1) * nx] for i in range(3))
    b_q, b_k, b_v = (params["b_attn"][i * nx:(i + 1) * nx].reshape(1, nx) for i in range(3))

    # ---- ln_1 + c_attn -> q, k, v   (each [M, nx], heads contiguous in columns) ----
    qkv_out = pl.pallas_call(
        functools.partial(_ln_qkv_kernel, eps=eps),
        out_shape=[jax.ShapeDtypeStruct((M, nx), dtype)] * 3,
        grid=(grid_m, grid_nq),
        in_specs=[
            pl.BlockSpec((tile_m, nx), lambda i, j: (i, 0)),
            pl.BlockSpec((1, nx), lambda i, j: (0, 0)),
            pl.BlockSpec((1, nx), lambda i, j: (0, 0)),
            pl.BlockSpec((nx, tile_nq), lambda i, j: (0, j)),      # w_q N-tile
            pl.BlockSpec((nx, tile_nq), lambda i, j: (0, j)),      # w_k N-tile
            pl.BlockSpec((nx, tile_nq), lambda i, j: (0, j)),      # w_v N-tile
            pl.BlockSpec((1, tile_nq), lambda i, j: (0, j)),
            pl.BlockSpec((1, tile_nq), lambda i, j: (0, j)),
            pl.BlockSpec((1, tile_nq), lambda i, j: (0, j)),
        ],
        out_specs=[pl.BlockSpec((tile_m, tile_nq), lambda i, j: (i, j))] * 3,
        compiler_params=_cparams(("parallel", "parallel")),
        cost_estimate=pl.CostEstimate(
            flops=2 * M * nx * 3 * nx,
            transcendentals=M * grid_nq,
            bytes_accessed=isz * (4 * M * nx + 3 * nx * nx),
        ),
    )(x2d, params["ln1_g"].reshape(1, nx), params["ln1_b"].reshape(1, nx),
      w_q, w_k, w_v, b_q, b_k, b_v)
    q3, k3, v3 = (t.reshape(B, T, nx) for t in qkv_out)

    # ---- causal attention, one (batch, head-group) per step; merged-head output ----
    attn = pl.pallas_call(
        functools.partial(_attn_kernel, n_heads_blk=hg, d=d, scale=scale),
        out_shape=jax.ShapeDtypeStruct((B, T, nx), dtype),
        grid=(B, n_head // hg),
        in_specs=[pl.BlockSpec((1, T, gw), lambda b, g: (b, 0, g))] * 3,
        out_specs=pl.BlockSpec((1, T, gw), lambda b, g: (b, 0, g)),
        compiler_params=_cparams(("parallel", "parallel")),
        cost_estimate=pl.CostEstimate(
            flops=4 * B * n_head * T * T * d,
            transcendentals=B * n_head * T * (T + 1),
            bytes_accessed=isz * 4 * B * T * nx,
        ),
    )(q3, k3, v3)
    a2d = attn.reshape(M, nx)          # already in merge_heads layout

    # ---- c_proj + residual + ln_2 + MLP (hidden dim K-tiled) + residual (fused) ----
    out2d = pl.pallas_call(
        functools.partial(_proj_mlp_kernel, eps=eps),
        out_shape=jax.ShapeDtypeStruct((M, nx), dtype),
        grid=(grid_m, grid_s),
        in_specs=[
            pl.BlockSpec((tile_m, nx), lambda i, j: (i, 0)),       # attn output
            pl.BlockSpec((tile_m, nx), lambda i, j: (i, 0)),       # residual x
            pl.BlockSpec((nx, nx), lambda i, j: (0, 0)),           # w_attn_proj (nx*nx, small)
            pl.BlockSpec((1, nx), lambda i, j: (0, 0)),
            pl.BlockSpec((1, nx), lambda i, j: (0, 0)),
            pl.BlockSpec((1, nx), lambda i, j: (0, 0)),
            pl.BlockSpec((nx, tile_s), lambda i, j: (0, j)),       # w_fc K-tile
            pl.BlockSpec((1, tile_s), lambda i, j: (0, j)),
            pl.BlockSpec((tile_s, nx), lambda i, j: (j, 0)),       # w_proj K-tile
            pl.BlockSpec((1, nx), lambda i, j: (0, 0)),
        ],
        out_specs=pl.BlockSpec((tile_m, nx), lambda i, j: (i, 0)),
        scratch_shapes=[
            pltpu.VMEM((tile_m, nx), jnp.float32),   # x + attn_proj residual (f32)
            pltpu.VMEM((tile_m, nx), wdtype),        # ln_2 output, MXU-ready dtype
            pltpu.VMEM((tile_m, nx), jnp.float32),   # MLP accumulator
        ],
        compiler_params=_cparams(("parallel", "arbitrary")),
        cost_estimate=pl.CostEstimate(
            flops=2 * M * nx * nx + 4 * M * nx * n_state,
            transcendentals=M + M * n_state,
            bytes_accessed=isz * (3 * M * nx + nx * nx + 2 * nx * n_state),
        ),
    )(a2d, x2d, params["w_attn_proj"], params["b_attn_proj"].reshape(1, nx),
      params["ln2_g"].reshape(1, nx), params["ln2_b"].reshape(1, nx),
      params["w_fc"], params["b_fc"].reshape(1, n_state),
      params["w_proj"], params["b_proj"].reshape(1, nx))

    return out2d.reshape(B, T, nx)


# ---------------------------------------------------------------------------
# Pure-JAX reference (mirrors the PyTorch Block forward, eval mode).
# ---------------------------------------------------------------------------
def _reference_block(x, params, *, n_head, eps, scale):
    B, T, nx = x.shape
    d = nx // n_head

    def ln(v, g, b):
        mu = jnp.mean(v, -1, keepdims=True)
        var = jnp.mean((v - mu) ** 2, -1, keepdims=True)
        return (v - mu) / jnp.sqrt(var + eps) * g + b

    y = ln(x, params["ln1_g"], params["ln1_b"])
    qkv = jnp.einsum("btx,xs->bts", y, params["w_attn"]) + params["b_attn"]
    q, k, v = jnp.split(qkv, 3, axis=-1)

    def split_heads(t):
        return t.reshape(B, T, n_head, d).transpose(0, 2, 1, 3)

    q, k, v = split_heads(q), split_heads(k), split_heads(v)
    w = jnp.einsum("bhqd,bhkd->bhqk", q, k)
    if scale:
        w = w / math.sqrt(d)
    causal = jnp.tril(jnp.ones((T, T), dtype=bool))
    w = jnp.where(causal, w, jnp.float32(-10000.0))
    p = jax.nn.softmax(w, axis=-1)
    a = jnp.einsum("bhqk,bhkd->bhqd", p, v)
    a = a.transpose(0, 2, 1, 3).reshape(B, T, nx)
    a = jnp.einsum("btx,xo->bto", a, params["w_attn_proj"]) + params["b_attn_proj"]
    x = x + a

    y = ln(x, params["ln2_g"], params["ln2_b"])
    h = jnp.einsum("btx,xs->bts", y, params["w_fc"]) + params["b_fc"]
    h = 0.5 * h * (1.0 + jnp.tanh(_GELU_C * (h + 0.044715 * h ** 3)))
    h2 = jnp.einsum("bts,sx->btx", h, params["w_proj"]) + params["b_proj"]
    return x + h2


if __name__ == "__main__":
    # Small GPT-2-style config: n_embd=32, n_head=4, n_ctx=8, MLP hidden = 4*n_embd.
    B, T, nx, n_head = 2, 8, 32, 4
    n_state = 4 * nx
    eps = 1e-5

    key = jax.random.PRNGKey(0)
    ks = jax.random.split(key, 12)
    x = jax.random.normal(ks[0], (B, T, nx), dtype=jnp.float32)
    params = dict(
        ln1_g=1.0 + 0.1 * jax.random.normal(ks[1], (nx,), jnp.float32),
        ln1_b=0.1 * jax.random.normal(ks[2], (nx,), jnp.float32),
        w_attn=0.02 * jax.random.normal(ks[3], (nx, 3 * nx), jnp.float32),
        b_attn=0.01 * jax.random.normal(ks[4], (3 * nx,), jnp.float32),
        w_attn_proj=0.02 * jax.random.normal(ks[5], (nx, nx), jnp.float32),
        b_attn_proj=0.01 * jax.random.normal(ks[6], (nx,), jnp.float32),
        ln2_g=1.0 + 0.1 * jax.random.normal(ks[7], (nx,), jnp.float32),
        ln2_b=0.1 * jax.random.normal(ks[8], (nx,), jnp.float32),
        w_fc=0.02 * jax.random.normal(ks[9], (nx, n_state), jnp.float32),
        b_fc=0.01 * jax.random.normal(ks[10], (n_state,), jnp.float32),
        w_proj=0.02 * jax.random.normal(ks[11], (n_state, nx), jnp.float32),
        b_proj=jnp.zeros((nx,), jnp.float32),
    )

    out = block_pallas(x, params, n_head=n_head, eps=eps, scale=True)
    out = jax.block_until_ready(out)

    ref = _reference_block(x, params, n_head=n_head, eps=eps, scale=True)
    assert out.shape == (B, T, nx)
    max_err = float(jnp.max(jnp.abs(out - ref)))
    assert jnp.allclose(out, ref, atol=2e-3, rtol=2e-3), max_err

    print("KERNEL_OK")
</pallas_src>

<mosaic_0001>
module attributes {stable_mosaic.version = 11 : i64} {
  func.func @_ln_qkv_kernel(%arg0: i32, %arg1: i32, %arg2: memref<16x32xf32, #tpu.memory_space<vmem>>, %arg3: memref<1x32xf32, #tpu.memory_space<vmem>>, %arg4: memref<1x32xf32, #tpu.memory_space<vmem>>, %arg5: memref<32x32xf32, #tpu.memory_space<vmem>>, %arg6: memref<32x32xf32, #tpu.memory_space<vmem>>, %arg7: memref<32x32xf32, #tpu.memory_space<vmem>>, %arg8: memref<1x32xf32, #tpu.memory_space<vmem>>, %arg9: memref<1x32xf32, #tpu.memory_space<vmem>>, %arg10: memref<1x32xf32, #tpu.memory_space<vmem>>, %arg11: memref<16x32xf32, #tpu.memory_space<vmem>>, %arg12: memref<16x32xf32, #tpu.memory_space<vmem>>, %arg13: memref<16x32xf32, #tpu.memory_space<vmem>>) attributes {dimension_semantics = [#tpu.dimension_semantics<parallel>, #tpu.dimension_semantics<parallel>], iteration_bounds = array<i64: 1, 1>, scalar_prefetch = 0 : i64, scratch_operands = 0 : i64, tpu.core_type = #tpu.core_type<tc>, window_params = [{transform_indices = @transform_0, window_bounds = array<i64: 16, 32>}, {pipeline_mode = #tpu.pipeline_mode<synchronous>, transform_indices = @transform_1, window_bounds = array<i64: 1, 32>}, {pipeline_mode = #tpu.pipeline_mode<synchronous>, transform_indices = @transform_2, window_bounds = array<i64: 1, 32>}, {transform_indices = @transform_3, window_bounds = array<i64: 32, 32>}, {transform_indices = @transform_4, window_bounds = array<i64: 32, 32>}, {transform_indices = @transform_5, window_bounds = array<i64: 32, 32>}, {transform_indices = @transform_6, window_bounds = array<i64: 1, 32>}, {transform_indices = @transform_7, window_bounds = array<i64: 1, 32>}, {transform_indices = @transform_8, window_bounds = array<i64: 1, 32>}, {transform_indices = @transform_9, window_bounds = array<i64: 16, 32>}, {transform_indices = @transform_10, window_bounds = array<i64: 16, 32>}, {transform_indices = @transform_11, window_bounds = array<i64: 16, 32>}]} {
    %c0 = arith.constant 0 : index
    %c0_0 = arith.constant 0 : index
    %0 = vector.load %arg2[%c0, %c0_0] : memref<16x32xf32, #tpu.memory_space<vmem>>, vector<16x32xf32>
    %cst = arith.constant dense<0.000000e+00> : vector<16xf32>
    %1 = vector.multi_reduction <add>, %0, %cst [1] : vector<16x32xf32> to vector<16xf32>
    %2 = vector.shape_cast %1 : vector<16xf32> to vector<16x1xf32>
    %cst_1 = arith.constant 3.200000e+01 : f32
    %3 = vector.broadcast %cst_1 : f32 to vector<16x1xf32>
    %4 = arith.divf %2, %3 : vector<16x1xf32>
    %5 = vector.broadcast %4 : vector<16x1xf32> to vector<16x32xf32>
    %6 = arith.subf %0, %5 : vector<16x32xf32>
    %7 = arith.mulf %6, %6 : vector<16x32xf32>
    %cst_2 = arith.constant dense<0.000000e+00> : vector<16xf32>
    %8 = vector.multi_reduction <add>, %7, %cst_2 [1] : vector<16x32xf32> to vector<16xf32>
    %9 = vector.shape_cast %8 : vector<16xf32> to vector<16x1xf32>
    %cst_3 = arith.constant 3.200000e+01 : f32
    %10 = vector.broadcast %cst_3 : f32 to vector<16x1xf32>
    %11 = arith.divf %9, %10 : vector<16x1xf32>
    %12 = vector.broadcast %4 : vector<16x1xf32> to vector<16x32xf32>
    %13 = arith.subf %0, %12 : vector<16x32xf32>
    %cst_4 = arith.constant 9.99999974E-6 : f32
    %14 = vector.broadcast %cst_4 : f32 to vector<16x1xf32>
    %15 = arith.addf %11, %14 : vector<16x1xf32>
    %16 = math.rsqrt %15 : vector<16x1xf32>
    %17 = vector.broadcast %16 : vector<16x1xf32> to vector<16x32xf32>
    %18 = arith.mulf %13, %17 : vector<16x32xf32>
    %c0_5 = arith.constant 0 : index
    %c0_6 = arith.constant 0 : index
    %19 = vector.load %arg3[%c0_5, %c0_6] : memref<1x32xf32, #tpu.memory_space<vmem>>, vector<1x32xf32>
    %20 = vector.broadcast %19 : vector<1x32xf32> to vector<16x32xf32>
    %21 = arith.mulf %18, %20 : vector<16x32xf32>
    %c0_7 = arith.constant 0 : index
    %c0_8 = arith.constant 0 : index
    %22 = vector.load %arg4[%c0_7, %c0_8] : memref<1x32xf32, #tpu.memory_space<vmem>>, vector<1x32xf32>
    %23 = vector.broadcast %22 : vector<1x32xf32> to vector<16x32xf32>
    %24 = arith.addf %21, %23 : vector<16x32xf32>
    %c0_9 = arith.constant 0 : index
    %c0_10 = arith.constant 0 : index
    %25 = vector.load %arg5[%c0_9, %c0_10] : memref<32x32xf32, #tpu.memory_space<vmem>>, vector<32x32xf32>
    %cst_11 = arith.constant dense<0.000000e+00> : vector<16x32xf32>
    %26 = tpu.matmul %24, %25, %cst_11 {dimension_numbers = #tpu.dot_dimension_numbers<[1], [0], [0], [1], [0, 0, 1, 1], [], []>} : vector<16x32xf32>, vector<32x32xf32>, vector<16x32xf32> -> vector<16x32xf32>
    %c0_12 = arith.constant 0 : index
    %c0_13 = arith.constant 0 : index
    %27 = vector.load %arg8[%c0_12, %c0_13] : memref<1x32xf32, #tpu.memory_space<vmem>>, vector<1x32xf32>
    %28 = vector.broadcast %27 : vector<1x32xf32> to vector<16x32xf32>
    %29 = arith.addf %26, %28 : vector<16x32xf32>
    %c0_14 = arith.constant 0 : index
    %c0_15 = arith.constant 0 : index
    %30 = vector.load %arg11[%c0_14, %c0_15] : memref<16x32xf32, #tpu.memory_space<vmem>>, vector<16x32xf32>
    tpu.vector_store %arg11[%c0_14, %c0_15], %29 {strides = array<i32>} : memref<16x32xf32, #tpu.memory_space<vmem>>, vector<16x32xf32>,
    %c0_16 = arith.constant 0 : index
    %c0_17 = arith.constant 0 : index
    %31 = vector.load %arg6[%c0_16, %c0_17] : memref<32x32xf32, #tpu.memory_space<vmem>>, vector<32x32xf32>
    %cst_18 = arith.constant dense<0.000000e+00> : vector<16x32xf32>
    %32 = tpu.matmul %24, %31, %cst_18 {dimension_numbers = #tpu.dot_dimension_numbers<[1], [0], [0], [1], [0, 0, 1, 1], [], []>} : vector<16x32xf32>, vector<32x32xf32>, vector<16x32xf32> -> vector<16x32xf32>
    %c0_19 = arith.constant 0 : index
    %c0_20 = arith.constant 0 : index
    %33 = vector.load %arg9[%c0_19, %c0_20] : memref<1x32xf32, #tpu.memory_space<vmem>>, vector<1x32xf32>
    %34 = vector.broadcast %33 : vector<1x32xf32> to vector<16x32xf32>
    %35 = arith.addf %32, %34 : vector<16x32xf32>
    %c0_21 = arith.constant 0 : index
    %c0_22 = arith.constant 0 : index
    %36 = vector.load %arg12[%c0_21, %c0_22] : memref<16x32xf32, #tpu.memory_space<vmem>>, vector<16x32xf32>
    tpu.vector_store %arg12[%c0_21, %c0_22], %35 {strides = array<i32>} : memref<16x32xf32, #tpu.memory_space<vmem>>, vector<16x32xf32>,
    %c0_23 = arith.constant 0 : index
    %c0_24 = arith.constant 0 : index
    %37 = vector.load %arg7[%c0_23, %c0_24] : memref<32x32xf32, #tpu.memory_space<vmem>>, vector<32x32xf32>
    %cst_25 = arith.constant dense<0.000000e+00> : vector<16x32xf32>
    %38 = tpu.matmul %24, %37, %cst_25 {dimension_numbers = #tpu.dot_dimension_numbers<[1], [0], [0], [1], [0, 0, 1, 1], [], []>} : vector<16x32xf32>, vector<32x32xf32>, vector<16x32xf32> -> vector<16x32xf32>
    %c0_26 = arith.constant 0 : index
    %c0_27 = arith.constant 0 : index
    %39 = vector.load %arg10[%c0_26, %c0_27] : memref<1x32xf32, #tpu.memory_space<vmem>>, vector<1x32xf32>
    %40 = vector.broadcast %39 : vector<1x32xf32> to vector<16x32xf32>
    %41 = arith.addf %38, %40 : vector<16x32xf32>
    %c0_28 = arith.constant 0 : index
    %c0_29 = arith.constant 0 : index
    %42 = vector.load %arg13[%c0_28, %c0_29] : memref<16x32xf32, #tpu.memory_space<vmem>>, vector<16x32xf32>
    tpu.vector_store %arg13[%c0_28, %c0_29], %41 {strides = array<i32>} : memref<16x32xf32, #tpu.memory_space<vmem>>, vector<16x32xf32>,
    return
  }
  func.func @transform_0(%arg0: i32, %arg1: i32) -> (i32, i32) {
    %c0_i32 = arith.constant 0 : i32
    %c0_i32_0 = arith.constant 0 : i32
    return %arg0, %c0_i32 : i32, i32
  }
  func.func @transform_1(%arg0: i32, %arg1: i32) -> (i32, i32) {
    %c0_i32 = arith.constant 0 : i32
    %c0_i32_0 = arith.constant 0 : i32
    %c0_i32_1 = arith.constant 0 : i32
    return %c0_i32, %c0_i32_0 : i32, i32
  }
  func.func @transform_2(%arg0: i32, %arg1: i32) -> (i32, i32) {
    %c0_i32 = arith.constant 0 : i32
    %c0_i32_0 = arith.constant 0 : i32
    %c0_i32_1 = arith.constant 0 : i32
    return %c0_i32, %c0_i32_0 : i32, i32
  }
  func.func @transform_3(%arg0: i32, %arg1: i32) -> (i32, i32) {
    %c0_i32 = arith.constant 0 : i32
    %c0_i32_0 = arith.constant 0 : i32
    return %c0_i32, %arg1 : i32, i32
  }
  func.func @transform_4(%arg0: i32, %arg1: i32) -> (i32, i32) {
    %c0_i32 = arith.constant 0 : i32
    %c0_i32_0 = arith.constant 0 : i32
    return %c0_i32, %arg1 : i32, i32
  }
  func.func @transform_5(%arg0: i32, %arg1: i32) -> (i32, i32) {
    %c0_i32 = arith.constant 0 : i32
    %c0_i32_0 = arith.constant 0 : i32
    return %c0_i32, %arg1 : i32, i32
  }
  func.func @transform_6(%arg0: i32, %arg1: i32) -> (i32, i32) {
    %c0_i32 = arith.constant 0 : i32
    %c0_i32_0 = arith.constant 0 : i32
    return %c0_i32, %arg1 : i32, i32
  }
  func.func @transform_7(%arg0: i32, %arg1: i32) -> (i32, i32) {
    %c0_i32 = arith.constant 0 : i32
    %c0_i32_0 = arith.constant 0 : i32
    return %c0_i32, %arg1 : i32, i32
  }
  func.func @transform_8(%arg0: i32, %arg1: i32) -> (i32, i32) {
    %c0_i32 = arith.constant 0 : i32
    %c0_i32_0 = arith.constant 0 : i32
    return %c0_i32, %arg1 : i32, i32
  }
  func.func @transform_9(%arg0: i32, %arg1: i32) -> (i32, i32) {
    %c0_i32 = arith.constant 0 : i32
    return %arg0, %arg1 : i32, i32
  }
  func.func @transform_10(%arg0: i32, %arg1: i32) -> (i32, i32) {
    %c0_i32 = arith.constant 0 : i32
    return %arg0, %arg1 : i32, i32
  }
  func.func @transform_11(%arg0: i32, %arg1: i32) -> (i32, i32) {
    %c0_i32 = arith.constant 0 : i32
    return %arg0, %arg1 : i32, i32
  }
}

</mosaic_0001>

<bundles_post_ra>
// kernel: tpu_custom_call.1
= control target key start
LH: loop header
LB: loop body
LE: loop exit
PB: predicated region body
PF: predicated region fallthrough
CT: control target
= control target key end

     0   :  { %17 = vsyncpa [#allocation3], 0  ;;  %s949_s0 = inlined_call_operand.hbm [shape: f32[16,32], index: 0, kind: input, shape index: {}]   ;;  %s950_s1 = inlined_call_operand.vmem [shape: f32[1,32], index: 1, kind: input, shape index: {}]   ;;  %s951_s2 = inlined_call_operand.vmem [shape: f32[1,32], index: 2, kind: input, shape index: {}]   ;;  %s952_s3 = inlined_call_operand.hbm [shape: f32[32,32], index: 3, kind: input, shape index: {}]   ;;  %s953_s4 = inlined_call_operand.hbm [shape: f32[32,32], index: 4, kind: input, shape index: {}]   ;;  %s954_s5 = inlined_call_operand.hbm [shape: f32[32,32], index: 5, kind: input, shape index: {}]   ;;  %s955_s6 = inlined_call_operand.vmem [shape: f32[1,32], index: 6, kind: input, shape index: {}]   ;;  %s956_s7 = inlined_call_operand.vmem [shape: f32[1,32], index: 7, kind: input, shape index: {}]   ;;  %s957_s8 = inlined_call_operand.vmem [shape: f32[1,32], index: 8, kind: input, shape index: {}]   ;;  %s958_s9 = inlined_call_operand.hbm [shape: f32[16,32], index: 9, kind: output, shape index: {0}]   ;;  %s959_s10 = inlined_call_operand.hbm [shape: f32[16,32], index: 10, kind: output, shape index: {1}]   ;;  %s960_s11 = inlined_call_operand.hbm [shape: f32[16,32], index: 11, kind: output, shape index: {2}]  }
   0x1   :  { %18 = vsyncpa [#allocation6], 0 }
   0x2   :  { %19 = vsyncpa [#allocation9], 0 }
   0x3   :  { %20 = vsyncpa [#allocation4], 0 }
   0x4   :  { %21 = vsyncpa [#allocation12], 0  ;;  %s723_s17 = smov [#allocation5]   ;;  %s724_s19 = smov [#allocation2]  }
   0x5   :  { %s43_s18 = sshll.u32 %s723_s17, 4  ;;  %s27_s20 = sshll.u32 %s724_s19, 4  ;;  %s44_s18 = int_to_ptr.vmem [resolvable:$true] %s43_s18  ;;  %s792_s20 = int_to_ptr.vmem [resolvable:$true] %s27_s20 }
   0x6   :  { %s559_s23 = scalar_lea.hbm %s952_s3, 512 }
   0x7   :  { %p560_p0 = scmp.ne.s32.totalorder %s952_s3, %s559_s23  ;;  %p563_p1 = scmp.lt.u32.totalorder %s559_s23, %s952_s3 }
   0x9   :  { %p565_p2 = pnand %p563_p1, %p560_p0 }
   0xb   :  { %568 = shalt.err (!%p565_p2)
}
   0xc   :  { %s569_s28 = scalar_lea.vmem %s44_s18, 512  ;;  %p574_p4 = scmp.lt.s32.totalorder %s44_s18, %s44_s18 }
   0xd   :  { %p570_p3 = scmp.ne.s32.totalorder %s44_s18, %s569_s28  ;;  %p575_p5 = scmp.lt.s32.totalorder %s569_s28, %s569_s28 }
   0xf   :  { %p576_p6 = por %p575_p5, %p574_p4 }
  0x11   :  { %p577_p7 = pnand %p576_p6, %p570_p3 }
  0x13   :  { %580 = shalt.err (!%p577_p7)
}
  0x14   :  { %s725_s29 = smov 128   ;;  %s726_s30 = smov 8  }
  0x15   :  { %49 = dma.hbm_to_vmem [thread:$0]  %s952_s3, 512, %s44_s18, [#allocation6], %s725_s29, %s725_s29, %s726_s30  }
  0x16   :  { %s581_s16 = scalar_lea.hbm %s949_s0, 256 }
  0x17   :  { %p582_p8 = scmp.ne.s32.totalorder %s949_s0, %s581_s16  ;;  %p585_p9 = scmp.lt.u32.totalorder %s581_s16, %s949_s0 }
  0x19   :  { %p587_p10 = pnand %p585_p9, %p582_p8 }
  0x1b   :  { %590 = shalt.err (!%p587_p10)
}
  0x1c   :  { %s591_s23 = scalar_lea.vmem %s792_s20, 256  ;;  %p596_p12 = scmp.lt.s32.totalorder %s792_s20, %s792_s20 }
  0x1d   :  { %p592_p11 = scmp.ne.s32.totalorder %s792_s20, %s591_s23  ;;  %p597_p13 = scmp.lt.s32.totalorder %s591_s23, %s591_s23 }
  0x1f   :  { %p598_p0 = por %p597_p13, %p596_p12 }
  0x21   :  { %p599_p1 = pnand %p598_p0, %p592_p11 }
  0x23   :  { %602 = shalt.err (!%p599_p1)
}
  0x24   :  { %33 = dma.hbm_to_vmem [thread:$0]  %s949_s0, 256, %s792_s20, [#allocation3], %s725_s29, %s725_s29, %s726_s30  }
  0x25   :  { %s727_s24 = smov [#allocation7]   ;;  %s728_s26 = smov [#allocation8]  }
  0x26   :  { %s55_s25 = sshll.u32 %s727_s24, 4  ;;  %s67_s27 = sshll.u32 %s728_s26, 4  ;;  %s56_s25 = int_to_ptr.vmem [resolvable:$true] %s55_s25  ;;  %s829_s27 = int_to_ptr.vmem [resolvable:$true] %s67_s27 }
  0x27   :  { %s603_s13 = scalar_lea.hbm %s953_s4, 512 }
  0x28   :  { %p604_p2 = scmp.ne.s32.totalorder %s953_s4, %s603_s13  ;;  %p607_p3 = scmp.lt.u32.totalorder %s603_s13, %s953_s4 }
  0x2a   :  { %p609_p4 = pnand %p607_p3, %p604_p2 }
  0x2c   :  { %612 = shalt.err (!%p609_p4)
}
  0x2d   :  { %s613_s0 = scalar_lea.vmem %s56_s25, 512  ;;  %p618_p6 = scmp.lt.s32.totalorder %s56_s25, %s56_s25 }
  0x2e   :  { %p614_p5 = scmp.ne.s32.totalorder %s56_s25, %s613_s0  ;;  %p619_p7 = scmp.lt.s32.totalorder %s613_s0, %s613_s0 }
  0x30   :  { %p620_p8 = por %p619_p7, %p618_p6 }
  0x32   :  { %p621_p9 = pnand %p620_p8, %p614_p5 }
  0x34   :  { %624 = shalt.err (!%p621_p9)
}
  0x35   :  { %61 = dma.hbm_to_vmem [thread:$0]  %s953_s4, 512, %s56_s25, [#allocation6], %s725_s29, %s725_s29, %s726_s30  }
  0x36   :  { %s625_s23 = scalar_lea.hbm %s954_s5, 512 }
  0x37   :  { %p626_p10 = scmp.ne.s32.totalorder %s954_s5, %s625_s23  ;;  %p629_p11 = scmp.lt.u32.totalorder %s625_s23, %s954_s5 }
  0x39   :  { %p631_p12 = pnand %p629_p11, %p626_p10 }
  0x3b   :  { %634 = shalt.err (!%p631_p12)
}
  0x3c   :  { %s635_s28 = scalar_lea.vmem %s829_s27, 512  ;;  %p640_p0 = scmp.lt.s32.totalorder %s829_s27, %s829_s27 }
  0x3d   :  { %p636_p13 = scmp.ne.s32.totalorder %s829_s27, %s635_s28  ;;  %p641_p1 = scmp.lt.s32.totalorder %s635_s28, %s635_s28 }
  0x3f   :  { %p642_p2 = por %p641_p1, %p640_p0 }
  0x41   :  { %p643_p3 = pnand %p642_p2, %p636_p13 }
  0x43   :  { %646 = shalt.err (!%p643_p3)
}
  0x44   :  { %73 = dma.hbm_to_vmem [thread:$0]  %s954_s5, 512, %s829_s27, [#allocation9], %s725_s29, %s725_s29, %s726_s30  }
  0x45   :  { %713 = dma.done.wait [#allocation3], 256  }
  0x46   :  { %714 = vsyncadd [#allocation3], 4294967040 }
  0x47   :  { %715 = dma.done.wait [#allocation6], 1024  }
  0x48   :  { %716 = vsyncadd [#allocation6], 4294966272 }
  0x49   :  { %717 = dma.done.wait [#allocation9], 512  }
  0x4a   :  { %718 = vsyncadd [#allocation9], 4294966784  ;;  %vm94_vm0 = vcmask 261120   ;;  %v92_v0 = vld [vmem:[#allocation2] sm:$0xff]  ;;  %v93_v1 = vld [vmem:[#allocation2 + $0x8] sm:$0xff]  ;;  %s729_s16 = smov [#allocation11]  }
  0x4b   :  { %v95_v2 = vsel %vm94_vm0, %v92_v0, 0.0  ;;  %v98_v3 = vsel %vm94_vm0, %v93_v1, 0.0  ;;  %v140_v14 = vld [vmem:[#allocation5] sm:$0xff]  ;;  %v141_v15 = vld [vmem:[#allocation5 + $0x8] sm:$0xff]  ;;  %v142_v19 = vld [vmem:[#allocation5 + $0x10] sm:$0xff]  ;;  %s427_s17 = sshll.u32 %s729_s16, 4  ;;  %s428_s17 = int_to_ptr.vmem [resolvable:$true] %s427_s17 }
  0x4c   :  { %96 = vadd.xlane.f32.xlu0 %v95_v2  ;;  %v234_v16 = vld [vmem:[#allocation7] sm:$0xff]  ;;  %v522_v17 = vpack.c.bf16 %v141_v15, %v140_v14  ;;  %v235_v18 = vld [vmem:[#allocation7 + $0x8] sm:$0xff]  ;;  %v143_v20 = vld [vmem:[#allocation5 + $0x18] sm:$0xff]  ;;  %s730_s0 = smov [#allocation10]   ;;  %s647_s19 = scalar_lea.vmem %s428_s17, 256 }
  0x4d   :  { %v530_v21 = vpack.c.bf16 %v235_v18, %v234_v16  ;;  %v526_v22 = vpack.c.bf16 %v143_v20, %v142_v19  ;;  %v236_v23 = vld [vmem:[#allocation7 + $0x10] sm:$0xff]  ;;  %v237_v24 = vld [vmem:[#allocation7 + $0x18] sm:$0xff]  ;;  %v322_v26 = vld [vmem:[#allocation8] sm:$0xff]  ;;  %s415_s20 = sshll.u32 %s730_s0, 4  ;;  %p648_p4 = scmp.ne.s32.totalorder %s428_s17, %s647_s19  ;;  %s890_s20 = int_to_ptr.vmem [resolvable:$true] %s415_s20 }
  0x4e   :  { %523 = vmatprep.subr.bf16.mxu0 %v522_v17  ;;  %v534_v25 = vpack.c.bf16 %v237_v24, %v236_v23  ;;  %v323_v27 = vld [vmem:[#allocation8 + $0x8] sm:$0xff]  ;;  %v460_v36 = vld [vmem:[%s950_s1] ss:$0 sm:$0xff]  ;;  %v325_v44 = vld [vmem:[#allocation8 + $0x18] sm:$0xff]  ;;  %p652_p5 = scmp.lt.s32.totalorder %s428_s17, %s428_s17  ;;  %p653_p6 = scmp.lt.s32.totalorder %s647_s19, %s647_s19 }
  0x4f   :  { %525 = vmatpush3.bf16.msra.mxu0 %v522_v17  ;;  %531 = vmatprep.subr.bf16.mxu1 %v530_v21  ;;  %v538_v28 = vpack.c.bf16 %v323_v27, %v322_v26  ;;  %v461_v38 = vld [vmem:[%s951_s2] ss:$0 sm:$0xff] }
  0x50   :  { %99 = vadd.xlane.f32.xlu0 %v98_v3  ;;  %533 = vmatpush3.bf16.msra.mxu1 %v530_v21  ;;  %v324_v43 = vld [vmem:[#allocation8 + $0x10] sm:$0xff]  ;;  %p654_p7 = por %p653_p6, %p652_p5 }
  0x51   :  { %527 = vmatprep.subr.bf16.mxu0 %v526_v22  ;;  %535 = vmatprep.subr.bf16.mxu1 %v534_v25  ;;  %v542_v47 = vpack.c.bf16 %v325_v44, %v324_v43  ;;  %v462_v48 = vld [vmem:[%s955_s6] ss:$0 sm:$0xff] }
  0x52   :  { %v465_v49 = vld [vmem:[%s956_s7] ss:$0 sm:$0xff]  ;;  %p655_p8 = pnand %p654_p7, %p648_p4 }
  0x53   :  { %529 = vmatpush3.bf16.msra.mxu0 %v526_v22  ;;  %v468_v58 = vld [vmem:[%s957_s8] ss:$0 sm:$0xff] }
  0x54   :  { %537 = vmatpush3.bf16.msra.mxu1 %v534_v25  ;;  %539 = vmatprep.subr.bf16.mxu0 %v538_v28 }
  0xd9   :  { %v97_v4 = vpop.xlane.xlu0 %96 }
  0xda   :  { %v102_v5 = vmul.f32 0.03125, %v97_v4 }
  0xdc   :  { %v104_v6 = vsub.f32 %v92_v0, %v102_v5 }
  0xdd   :  { %v100_v7 = vpop.xlane.xlu0 %99 }
  0xde   :  { %v103_v8 = vmul.f32 0.03125, %v100_v7  ;;  %v106_v9 = vmul.f32 %v104_v6, %v104_v6 }
  0xe0   :  { %v105_v10 = vsub.f32 %v93_v1, %v103_v8  ;;  %v108_v11 = vsel %vm94_vm0, %v106_v9, 0.0 }
  0xe1   :  { %109 = vadd.xlane.f32.xlu1 %v108_v11 }
  0xe2   :  { %v107_v12 = vmul.f32 %v105_v10, %v105_v10 }
  0xe4   :  { %v111_v13 = vsel %vm94_vm0, %v107_v12, 0.0 }
  0xe5   :  { %112 = vadd.xlane.f32.xlu1 %v111_v13 }
 0x16e   :  { %v110_v29 = vpop.xlane.xlu1 %109 }
 0x16f   :  { %v114_v30 = vmul.f32 0.03125, %v110_v29 }
 0x171   :  { %v116_v31 = vadd.f32 1e-05, %v114_v30 }
 0x172   :  { %v113_v32 = vpop.xlane.xlu1 %112 }
 0x173   :  { %555 = vrsqrt.f32 %v116_v31  ;;  %v115_v33 = vmul.f32 0.03125, %v113_v32 }
 0x175   :  { %v117_v34 = vadd.f32 1e-05, %v115_v33 }
 0x177   :  { %557 = vrsqrt.f32 %v117_v34 }
 0x17d   :  { %v556_v35 = vpop.eup %555 }
 0x17e   :  { %v120_v37 = vmul.f32 %v556_v35, %v104_v6 }
 0x180   :  { %v129_v39 = vmul.f32 %v460_v36, %v120_v37 }
 0x181   :  { %v558_v40 = vpop.eup %557 }
 0x182   :  { %v121_v41 = vmul.f32 %v558_v40, %v105_v10  ;;  %v138_v42 = vadd.f32 %v461_v38, %v129_v39 }
 0x184   :  { %v130_v45 = vmul.f32 %v460_v36, %v121_v41  ;;  %497 = vmatprep.mubr.msk.f32.mxu0 %vm94_vm0, %v138_v42  ;;  %508 = vmatprep.mubr.msk.f32.mxu1 %vm94_vm0, %v138_v42 }
 0x186   :  { %v139_v46 = vadd.f32 %v461_v38, %v130_v45 }
 0x188   :  { %498 = vmatmul.mubr.msk.f32.vlgmr.msra.gmra.mrb[0].mxu0 %vm94_vm0, %v139_v46  ;;  %509 = vmatmul.mubr.msk.f32.vlgmr.msra.gmra.mrb[0].mxu1 %vm94_vm0, %v139_v46 }
 0x189   :  { %541 = vmatpush3.bf16.msra.mxu0 %v538_v28  ;;  %519 = vmatprep.mubr.msk.f32.mxu0 %vm94_vm0, %v138_v42 }
 0x18a   :  { %543 = vmatprep.subr.bf16.mxu0 %v542_v47 }
 0x18d   :  { %545 = vmatpush3.bf16.msra.mxu0 %v542_v47 }
 0x190   :  { %520 = vmatmul.mubr.msk.f32.vlgmr.msra.gmra.mrb[2].mxu0 %vm94_vm0, %v139_v46 }
 0x25b   :  { %v499_v50 = vpop.f32.mrb[0].mxu0  ;;  %v510_v51 = vpop.f32.mrb[0].mxu1 }
 0x25c   :  { %v229_v52 = vadd.f32 %v499_v50, %v462_v48  ;;  %v317_v53 = vadd.f32 %v510_v51, %v465_v49  ;;  %v223_v54 = vpop.f32.mrb[1].mxu0  ;;  %v311_v55 = vpop.f32.mrb[1].mxu1 }
 0x25d   :  { %v224_v56 = vadd.f32 %v462_v48, %v223_v54  ;;  %v312_v57 = vadd.f32 %v465_v49, %v311_v55 }
 0x25e   :  { %233 = vst.msk [vmem:[#allocation10 + $0x8] sm:$0xff] %vm94_vm0, %v229_v52  ;;  %321 = vst.msk [vmem:[#allocation11 + $0x8] sm:$0xff] %vm94_vm0, %v317_v53 }
 0x25f   :  { %232 = vst.msk [vmem:[#allocation10] sm:$0xff] %vm94_vm0, %v224_v56  ;;  %320 = vst.msk [vmem:[#allocation11] sm:$0xff] %vm94_vm0, %v312_v57 }
 0x260   :  { %658 = shalt.err (!%p655_p8)
}
 0x261   :  { %s659_s23 = scalar_lea.hbm %s959_s10, 256 }
 0x262   :  { %p660_p9 = scmp.ne.s32.totalorder %s959_s10, %s659_s23  ;;  %p663_p10 = scmp.lt.u32.totalorder %s659_s23, %s959_s10 }
 0x264   :  { %p665_p11 = pnand %p663_p10, %p660_p9 }
 0x266   :  { %668 = shalt.err (!%p665_p11)
}
 0x267   :  { %433 = dma.vmem_to_hbm [thread:$0]  %s428_s17, 256, %s959_s10, [#allocation12], %s725_s29, %s725_s29, %s726_s30  }
 0x268   :  { %s669_s4 = scalar_lea.vmem %s890_s20, 256  ;;  %p674_p13 = scmp.lt.s32.totalorder %s890_s20, %s890_s20 }
 0x269   :  { %p670_p12 = scmp.ne.s32.totalorder %s890_s20, %s669_s4  ;;  %p675_p0 = scmp.lt.s32.totalorder %s669_s4, %s669_s4 }
 0x26b   :  { %p676_p1 = por %p675_p0, %p674_p13 }
 0x26d   :  { %p677_p2 = pnand %p676_p1, %p670_p12 }
 0x26f   :  { %680 = shalt.err (!%p677_p2)
}
 0x270   :  { %s681_s27 = scalar_lea.hbm %s958_s9, 256 }
 0x271   :  { %p682_p3 = scmp.ne.s32.totalorder %s958_s9, %s681_s27  ;;  %p685_p4 = scmp.lt.u32.totalorder %s681_s27, %s958_s9 }
 0x273   :  { %p687_p5 = pnand %p685_p4, %p682_p3 }
 0x275   :  { %690 = shalt.err (!%p687_p5)
}
 0x276   :  { %421 = dma.vmem_to_hbm [thread:$0]  %s890_s20, 256, %s958_s9, [#allocation4], %s725_s29, %s725_s29, %s726_s30   ;;  %v521_v59 = vpop.f32.mrb[2].mxu0 }
 0x277   :  { %s731_s15 = smov [#allocation13]   ;;  %v405_v60 = vadd.f32 %v521_v59, %v468_v58  ;;  %v399_v61 = vpop.f32.mrb[3].mxu0 }
 0x278   :  { %s439_s16 = sshll.u32 %s731_s15, 4  ;;  %v400_v62 = vadd.f32 %v468_v58, %v399_v61  ;;  %s440_s16 = int_to_ptr.vmem [resolvable:$true] %s439_s16 }
 0x279   :  { %409 = vst.msk [vmem:[#allocation13 + $0x8] sm:$0xff] %vm94_vm0, %v405_v60  ;;  %s691_s17 = scalar_lea.vmem %s440_s16, 256  ;;  %p696_p7 = scmp.lt.s32.totalorder %s440_s16, %s440_s16 }
 0x27a   :  { %408 = vst.msk [vmem:[#allocation13] sm:$0xff] %vm94_vm0, %v400_v62  ;;  %p692_p6 = scmp.ne.s32.totalorder %s440_s16, %s691_s17  ;;  %p697_p8 = scmp.lt.s32.totalorder %s691_s17, %s691_s17 }
 0x27c   :  { %p698_p9 = por %p697_p8, %p696_p7 }
 0x27e   :  { %p699_p10 = pnand %p698_p9, %p692_p6 }
 0x280   :  { %702 = shalt.err (!%p699_p10)
}
 0x281   :  { %s703_s20 = scalar_lea.hbm %s960_s11, 256 }
 0x282   :  { %p704_p11 = scmp.ne.s32.totalorder %s960_s11, %s703_s20  ;;  %p707_p12 = scmp.lt.u32.totalorder %s703_s20, %s960_s11 }
 0x284   :  { %p709_p13 = pnand %p707_p12, %p704_p11 }
 0x286   :  { %712 = shalt.err (!%p709_p13)
}
 0x287   :  { %445 = dma.vmem_to_hbm [thread:$0]  %s440_s16, 256, %s960_s11, [#allocation12], %s725_s29, %s725_s29, %s726_s30  }
 0x288   :  { %719 = dma.done.wait [#allocation4], 256  }
 0x289   :  { %720 = vsyncadd [#allocation4], 4294967040 }
 0x28a   :  { %721 = dma.done.wait [#allocation12], 512  }
 0x28b   :  { %722 = vsyncadd [#allocation12], 4294966784 }
 0x28c   :  { %455 = vsyncpa [#allocation3], 1 }
 0x28d   :  { %456 = vsyncpa [#allocation6], 1 }
 0x28e   :  { %457 = vsyncpa [#allocation9], 1 }
 0x28f   :  { %458 = vsyncpa [#allocation4], 1 }
 0x290   :  { %459 = vsyncpa [#allocation12], 1 }

</bundles_post_ra>
